<compile_context>
chip_gen: v7x
topology: tpu7x:2x2x1
jax: 0.10.0
libtpu: 0.0.40
codegen_flags: <defaults>
</compile_context>

<pallas_src>
import jax
import jax.numpy as jnp
from jax.experimental import pallas as pl
from jax.experimental.pallas import tpu as pltpu


def _linreg_kernel(w_ref, b_ref, x_ref, o_ref):
    # Scalar params read from SMEM, broadcast over the VMEM tile on the VPU.
    w = w_ref[0, 0]
    b = b_ref[0, 0]
    y = w * x_ref[...].astype(jnp.float32) + b
    o_ref[...] = y.astype(o_ref.dtype)


def linear_regression(x: jax.Array, w: jax.Array, b: jax.Array,
                      *, lanes: int = 1024,
                      target_block_bytes: int = 4 << 20) -> jax.Array:
    """y = w * x + b, elementwise with scalar w, b (matching nn.Parameter(randn(1)))."""
    orig_shape = x.shape
    orig_dtype = x.dtype
    total = x.size
    itemsize = jnp.dtype(orig_dtype).itemsize

    w2 = jnp.asarray(w, jnp.float32).reshape(1, 1)
    b2 = jnp.asarray(b, jnp.float32).reshape(1, 1)

    # ---- reshape x into a lane-dense (rows, lanes) slab -------------------------------
    rows = pl.cdiv(total, lanes)

    # Pick block_rows so one block is ~target_block_bytes, rounded to a multiple of 32
    # sublanes (covers f32 / bf16 / int8 packed tiling).
    sub_align = 32
    block_rows = max(sub_align,
                     (target_block_bytes // (lanes * itemsize)) // sub_align * sub_align)
    if rows <= block_rows:
        # Tiny input: single full-array block, no grid-step overhead.
        block_rows = rows

    rows_p = pl.cdiv(rows, block_rows) * block_rows
    pad = rows_p * lanes - total
    flat = x.reshape(-1)
    if pad:
        flat = jnp.concatenate([flat, jnp.zeros((pad,), orig_dtype)])
    x2 = flat.reshape(rows_p, lanes)

    grid = (rows_p // block_rows,)

    y2 = pl.pallas_call(
        _linreg_kernel,
        out_shape=jax.ShapeDtypeStruct((rows_p, lanes), orig_dtype),
        grid_spec=pl.GridSpec(
            grid=grid,
            in_specs=[
                pl.BlockSpec(memory_space=pltpu.SMEM),              # w (1,1) scalar
                pl.BlockSpec(memory_space=pltpu.SMEM),              # b (1,1) scalar
                pl.BlockSpec((block_rows, lanes), lambda i: (i, 0)),  # x slab tile
            ],
            out_specs=pl.BlockSpec((block_rows, lanes), lambda i: (i, 0)),
        ),
        compiler_params=pltpu.CompilerParams(
            dimension_semantics=("parallel",),
            vmem_limit_bytes=32 << 20,
        ),
    )(w2, b2, x2)

    return y2.reshape(-1)[:total].reshape(orig_shape)


if __name__ == "__main__":
    key = jax.random.PRNGKey(0)
    kx, kw, kb, kx2 = jax.random.split(key, 4)

    # Deterministic "parameters" (same shapes as torch.randn(1) params).
    w = jax.random.normal(kw, (1,), dtype=jnp.float32)
    b = jax.random.normal(kb, (1,), dtype=jnp.float32)

    # Small input consistent with the regression workflow (batch of feature rows).
    x = jax.random.normal(kx, (16, 128), dtype=jnp.float32)
    y = jax.block_until_ready(linear_regression(x, w, b))
    y_ref = w[0] * x + b[0]
    assert y.shape == x.shape and y.dtype == x.dtype
    assert jnp.allclose(y, y_ref, atol=1e-6, rtol=1e-6)

    # Second small case with a non-128-aligned trailing dim (exercises the padding path).
    x_odd = jax.random.normal(kx2, (7, 100), dtype=jnp.float32)
    y_odd = jax.block_until_ready(linear_regression(x_odd, w, b))
    assert jnp.allclose(y_odd, w[0] * x_odd + b[0], atol=1e-6, rtol=1e-6)

    print("KERNEL_OK")
</pallas_src>

<mosaic_0001>
module attributes {stable_mosaic.version = 11 : i64} {
  func.func @_linreg_kernel(%arg0: i32, %arg1: memref<1x1xf32, #tpu.memory_space<smem>>, %arg2: memref<1x1xf32, #tpu.memory_space<smem>>, %arg3: memref<2x1024xf32, #tpu.memory_space<vmem>>, %arg4: memref<2x1024xf32, #tpu.memory_space<vmem>>) attributes {dimension_semantics = [#tpu.dimension_semantics<parallel>], iteration_bounds = array<i64: 1>, scalar_prefetch = 0 : i64, scratch_operands = 0 : i64, tpu.core_type = #tpu.core_type<tc>, window_params = [{transform_indices = @transform_0, window_bounds = array<i64: 1, 1>}, {transform_indices = @transform_1, window_bounds = array<i64: 1, 1>}, {transform_indices = @transform_2, window_bounds = array<i64: 2, 1024>}, {transform_indices = @transform_3, window_bounds = array<i64: 2, 1024>}]} {
    %c0 = arith.constant 0 : index
    %c0_0 = arith.constant 0 : index
    %0 = memref.load %arg1[%c0, %c0_0] : memref<1x1xf32, #tpu.memory_space<smem>>
    %c0_1 = arith.constant 0 : index
    %c0_2 = arith.constant 0 : index
    %1 = memref.load %arg2[%c0_1, %c0_2] : memref<1x1xf32, #tpu.memory_space<smem>>
    %c0_3 = arith.constant 0 : index
    %c0_4 = arith.constant 0 : index
    %2 = vector.load %arg3[%c0_3, %c0_4] : memref<2x1024xf32, #tpu.memory_space<vmem>>, vector<2x1024xf32>
    %3 = vector.broadcast %0 : f32 to vector<2x1024xf32>
    %4 = arith.mulf %3, %2 : vector<2x1024xf32>
    %5 = vector.broadcast %1 : f32 to vector<2x1024xf32>
    %6 = arith.addf %4, %5 : vector<2x1024xf32>
    %c0_5 = arith.constant 0 : index
    %c0_6 = arith.constant 0 : index
    %7 = vector.load %arg4[%c0_5, %c0_6] : memref<2x1024xf32, #tpu.memory_space<vmem>>, vector<2x1024xf32>
    tpu.vector_store %arg4[%c0_5, %c0_6], %6 {strides = array<i32>} : memref<2x1024xf32, #tpu.memory_space<vmem>>, vector<2x1024xf32>,
    return
  }
  func.func @transform_0(%arg0: i32) -> (i32, i32) {
    %c0_i32 = arith.constant 0 : i32
    %c0_i32_0 = arith.constant 0 : i32
    %c0_i32_1 = arith.constant 0 : i32
    return %c0_i32, %c0_i32_0 : i32, i32
  }
  func.func @transform_1(%arg0: i32) -> (i32, i32) {
    %c0_i32 = arith.constant 0 : i32
    %c0_i32_0 = arith.constant 0 : i32
    %c0_i32_1 = arith.constant 0 : i32
    return %c0_i32, %c0_i32_0 : i32, i32
  }
  func.func @transform_2(%arg0: i32) -> (i32, i32) {
    %c0_i32 = arith.constant 0 : i32
    %c0_i32_0 = arith.constant 0 : i32
    return %arg0, %c0_i32 : i32, i32
  }
  func.func @transform_3(%arg0: i32) -> (i32, i32) {
    %c0_i32 = arith.constant 0 : i32
    %c0_i32_0 = arith.constant 0 : i32
    return %arg0, %c0_i32 : i32, i32
  }
}

</mosaic_0001>

<bundles_post_ra>
// kernel: tpu_custom_call.1
= control target key start
LH: loop header
LB: loop body
LE: loop exit
PB: predicated region body
PF: predicated region fallthrough
CT: control target
= control target key end

     0   :  { %10 = vsyncpa [#allocation5], 0  ;;  %s158_s0 = inlined_call_operand.<no memory space> [shape: f32[1,1], index: 0, kind: input, shape index: {}]   ;;  %s159_s1 = inlined_call_operand.<no memory space> [shape: f32[1,1], index: 1, kind: input, shape index: {}]   ;;  %s160_s2 = inlined_call_operand.hbm [shape: f32[2,1024], index: 2, kind: input, shape index: {}]   ;;  %s161_s3 = inlined_call_operand.hbm [shape: f32[2,1024], index: 3, kind: output, shape index: {}]  }
   0x1   :  { %11 = vsyncpa [#allocation6], 0  ;;  %s106_s12 = smov [#allocation4]   ;;  %s58_s16 = scalar_lea.hbm %s160_s2, 256 }
   0x2   :  { %s22_s13 = sshll.u32 %s106_s12, 4  ;;  %p59_p0 = scmp.ne.s32.totalorder %s160_s2, %s58_s16  ;;  %s23_s13 = int_to_ptr.vmem [resolvable:$true] %s22_s13 }
   0x3   :  { %p62_p1 = scmp.lt.u32.totalorder %s58_s16, %s160_s2 }
   0x5   :  { %p64_p2 = pnand %p62_p1, %p59_p0 }
   0x7   :  { %67 = shalt.err (!%p64_p2)
}
   0x8   :  { %s68_s21 = scalar_lea.vmem %s23_s13, 256  ;;  %p73_p4 = scmp.lt.s32.totalorder %s23_s13, %s23_s13 }
   0x9   :  { %p69_p3 = scmp.ne.s32.totalorder %s23_s13, %s68_s21  ;;  %p74_p5 = scmp.lt.s32.totalorder %s68_s21, %s68_s21 }
   0xb   :  { %p75_p6 = por %p74_p5, %p73_p4 }
   0xd   :  { %p76_p7 = pnand %p75_p6, %p69_p3 }
   0xf   :  { %79 = shalt.err (!%p76_p7)
}
  0x10   :  { %25 = dma.hbm_to_vmem [thread:$0]  %s160_s2, 256, %s23_s13, [#allocation5]  }
  0x11   :  { %102 = dma.done.wait [#allocation5], 256  }
  0x12   :  { %103 = vsyncadd [#allocation5], 4294967040  ;;  %v33_v0 = vstv %s158_s0  ;;  %v31_v1 = vld [vmem:[#allocation4] sm:$0xff]  ;;  %v36_v2 = vstv %s159_s1  ;;  %v32_v3 = vld [vmem:[#allocation4 + $0x8] sm:$0xff]  ;;  %s107_s28 = smov [#allocation7]  }
  0x13   :  { %s47_s29 = sshll.u32 %s107_s28, 4  ;;  %v34_v4 = vmul.f32 %v33_v0, %v31_v1  ;;  %v35_v5 = vmul.f32 %v33_v0, %v32_v3  ;;  %s48_s29 = int_to_ptr.vmem [resolvable:$true] %s47_s29 }
  0x14   :  { %s80_s2 = scalar_lea.vmem %s48_s29, 256  ;;  %p85_p9 = scmp.lt.s32.totalorder %s48_s29, %s48_s29 }
  0x15   :  { %v37_v6 = vadd.f32 %v36_v2, %v34_v4  ;;  %v38_v7 = vadd.f32 %v36_v2, %v35_v5  ;;  %p81_p8 = scmp.ne.s32.totalorder %s48_s29, %s80_s2  ;;  %p86_p10 = scmp.lt.s32.totalorder %s80_s2, %s80_s2 }
  0x17   :  { %39 = vst [vmem:[#allocation7] sm:$0xff] %v37_v6  ;;  %40 = vst [vmem:[#allocation7 + $0x8] sm:$0xff] %v38_v7  ;;  %p87_p11 = por %p86_p10, %p85_p9 }
  0x19   :  { %p88_p12 = pnand %p87_p11, %p81_p8 }
  0x1b   :  { %91 = shalt.err (!%p88_p12)
}
  0x1c   :  { %s92_s1 = scalar_lea.hbm %s161_s3, 256 }
  0x1d   :  { %p93_p13 = scmp.ne.s32.totalorder %s161_s3, %s92_s1  ;;  %p96_p0 = scmp.lt.u32.totalorder %s92_s1, %s161_s3 }
  0x1f   :  { %p98_p1 = pnand %p96_p0, %p93_p13 }
  0x21   :  { %101 = shalt.err (!%p98_p1)
}
  0x22   :  { %50 = dma.vmem_to_hbm [thread:$0]  %s48_s29, 256, %s161_s3, [#allocation6]  }
  0x23   :  { %104 = dma.done.wait [#allocation6], 256  }
  0x24   :  { %105 = vsyncadd [#allocation6], 4294967040 }
  0x25   :  { %54 = vsyncpa [#allocation5], 1 }
  0x26   :  { %55 = vsyncpa [#allocation6], 1 }

</bundles_post_ra>
